<compile_context>
chip_gen: v6e
topology: v6e:2x2x1
jax: 0.10.0
libtpu: 0.0.40
codegen_flags: <defaults>
</compile_context>

<pallas_src>
import functools

import jax
import jax.numpy as jnp
from jax.experimental import pallas as pl
from jax.experimental.pallas import tpu as pltpu

_NEG = -1e30   # bias for padded logit lanes: exp(-1e30 - m) == 0 exactly in f32
LANE = 128     # TPU lane width; slab rows and both outputs are LANE wide


def _round_up(x, m):
    return ((x + m - 1) // m) * m


# --------------------------------------------------------------------------
# Pallas kernel: input_fc -> GRUCell -> output_fc -> log-softmax (one pass)
# --------------------------------------------------------------------------
def _actor_kernel(obs_ref, emb_ref, h_ref, slab_ref, logp_ref, hout_ref,
                  *, H, offs):
    """One batch tile per grid step.  All weights live in a single packed
    (R, 128) slab carved up with STATIC row slices (zero runtime cost).

    NOTE (partial final batch tile): out-of-bounds rows of obs/emb/h hold
    unspecified data, so exp/tanh may produce inf/NaN in those rows.  This is
    safe because every reduction here is strictly per-row (lane reductions
    only) and the partial-block writeback is masked.  Keep it that way if you
    ever add a cross-row reduction.
    """
    f32 = jnp.float32
    obs = obs_ref[...]
    emb = emb_ref[...]
    h = h_ref[...]
    d_obs = obs.shape[-1]
    d_emb = emb.shape[-1]

    def w(name, nrows):                      # static row-slice view of the slab
        o = offs[name]
        return slab_ref[o:o + nrows, :]

    def bias(row):                           # (1, 128) bias row
        o = offs["bias"] + row
        return slab_ref[o:o + 1, :]

    def sigmoid(v):                          # 0.5*(1+tanh(v/2)): one EUP op
        return 0.5 * (jnp.tanh(0.5 * v) + 1.0)

    # input_fc: ReLU(concat(inputs, task_emb) @ W_in + b_in), realised with a
    # split W_in.  Lanes H:128 carry zero weights/bias, so x1 pad lanes are 0.
    x1 = jnp.maximum(
        jnp.dot(obs, w("wia", d_obs), preferred_element_type=f32)
        + jnp.dot(emb, w("wib", d_emb), preferred_element_type=f32)
        + bias(0), 0.0)                                          # (tb, 128)

    # GRUCell (PyTorch gate order r, z, n): six narrow matmuls fused into TWO
    # wide dots; gates are static lane slices of the results.
    gi = jnp.dot(x1, w("wih", LANE), preferred_element_type=f32) + bias(1)
    gh = jnp.dot(h, w("whh", H), preferred_element_type=f32) + bias(2)
    r = sigmoid(gi[:, 0:H] + gh[:, 0:H])
    z = sigmoid(gi[:, H:2 * H] + gh[:, H:2 * H])
    n = jnp.tanh(gi[:, 2 * H:3 * H] + r * gh[:, 2 * H:3 * H])
    h_new = (1.0 - z) * n + z * h                                # (tb, H)

    # Lane-dense hidden-state store: embed (tb, H) into lanes 0:H of a
    # (tb, 128) slab via a tiny exact identity matmul (rides idle MXU slack),
    # so the vst is full-width instead of a masked 32-lane vst.msk.
    hout_ref[...] = jnp.dot(h_new, w("eye", H),
                            preferred_element_type=f32).astype(hout_ref.dtype)

    # output_fc + log-softmax.  Action dim is padded to 128 lanes through
    # W3/b3 (zero weight cols, -1e30 bias).  The logit path stays f32, so the
    # padded columns contribute exactly 0 to the softmax sum.
    x2 = jnp.maximum(
        jnp.dot(h_new, w("w2", H), preferred_element_type=f32) + bias(3), 0.0)
    logits = jnp.dot(x2, w("w3", LANE), preferred_element_type=f32) + bias(4)

    m = jnp.max(logits, axis=-1, keepdims=True)
    shifted = logits - m
    lse = jnp.log(jnp.sum(jnp.exp(shifted), axis=-1, keepdims=True))
    logp_ref[...] = (shifted - lse).astype(logp_ref.dtype)


# --------------------------------------------------------------------------
# Tiling heuristics (generation-aware)
# --------------------------------------------------------------------------
def _num_tensorcores():
    """2 TensorCores per chip on v7x-class parts, 1 on v5e/v6e.  Falls back to
    1 (single large block) if the device kind can't be identified."""
    try:
        kind = jax.devices()[0].device_kind.lower()
    except Exception:
        return 1
    return 2 if "v7" in kind else 1


def _pick_tile(B, num_tc, tb_cap):
    """Batch tile:
       * single-TC chips (v5e/v6e): one grid step whenever the batch fits the
         cap -- no point paying per-step overhead for a nonexistent 2nd core.
       * v7x megacore: split only for large batches, keep an even step count
         with 2-4 steps per core so each core retains compute/DMA overlap."""
    B8 = _round_up(max(int(B), 1), 8)
    tb_cap = max(8, _round_up(int(tb_cap), 8))
    if num_tc <= 1 or B8 < 512 * num_tc:
        return min(tb_cap, B8)
    steps_per_core = 2 if B8 < 4096 * num_tc else 4
    tb = _round_up(-(-B8 // (steps_per_core * num_tc)), 8)
    return max(8, min(tb_cap, tb))


# --------------------------------------------------------------------------
# Wrapper: fused forward (returns log_probs over actions + new hidden state)
# --------------------------------------------------------------------------
def actor_forward(inputs, task_emb, hiddens, params, *, tb=2048):
    if task_emb is None:
        # TODO(synk): task_emb_dim == 0 and len(actor_hiddens) == 1 config
        # branches of RecurrentActor are not implemented in the fused kernel.
        raise NotImplementedError("fused kernel expects a task embedding")

    H = params["H"]
    A = params["num_actions"]
    slab = params["slab"]
    offs = params["offs"]

    h_shape = hiddens.shape
    if hiddens.ndim > 2:                 # module reshapes >2-D hiddens to (-1, H)
        hiddens = hiddens.reshape(-1, H)
        inputs = inputs.reshape(-1, inputs.shape[-1])
        task_emb = task_emb.reshape(-1, task_emb.shape[-1])

    B, d_obs = inputs.shape
    d_emb = task_emb.shape[-1]

    tb_eff = _pick_tile(B, _num_tensorcores(), tb)
    grid = (pl.cdiv(B, tb_eff),)

    kernel = functools.partial(_actor_kernel, H=H, offs=offs)

    in_specs = [
        pl.BlockSpec((tb_eff, d_obs), lambda i: (i, 0)),
        pl.BlockSpec((tb_eff, d_emb), lambda i: (i, 0)),
        pl.BlockSpec((tb_eff, H), lambda i: (i, 0)),
        pl.BlockSpec(slab.shape, lambda i: (0, 0)),    # one packed weight stream
    ]
    out_specs = [
        pl.BlockSpec((tb_eff, LANE), lambda i: (i, 0)),  # log-probs (lane-dense)
        pl.BlockSpec((tb_eff, LANE), lambda i: (i, 0)),  # hidden    (lane-dense)
    ]

    # VMEM budget: double-buffered row streams + resident slab + slack.
    stream_bytes = 2 * tb_eff * (d_obs + d_emb + H + 2 * LANE) * 4
    weight_bytes = 2 * int(slab.size) * 4
    vmem_limit = int(min(max(stream_bytes + weight_bytes + (4 << 20), 16 << 20),
                         48 << 20))

    logp_pad, h_pad = pl.pallas_call(
        kernel,
        out_shape=(jax.ShapeDtypeStruct((B, LANE), jnp.float32),
                   jax.ShapeDtypeStruct((B, LANE), jnp.float32)),
        grid_spec=pltpu.PrefetchScalarGridSpec(
            num_scalar_prefetch=0,
            grid=grid,
            in_specs=in_specs,
            out_specs=out_specs,
        ),
        compiler_params=pltpu.CompilerParams(
            dimension_semantics=("parallel",),
            vmem_limit_bytes=vmem_limit,
        ),
    )(inputs, task_emb, hiddens, slab)

    log_probs = logp_pad[:, :A]   # drop padded lanes (kernel stores lane-dense)
    h_new = h_pad[:, :H]

    if len(h_shape) > 2:
        h_new = h_new.reshape(h_shape)
        log_probs = log_probs.reshape(h_shape[:-1] + (A,))
    return log_probs, h_new


# --------------------------------------------------------------------------
# Parameter init (mirrors the module: orthogonal(sqrt(2)) Linears with bias 0;
# GRUCell default uniform(-1/sqrt(H), 1/sqrt(H))), packed into one slab.
# --------------------------------------------------------------------------
def _orthogonal(key, out_dim, in_dim, gain):
    n_max, n_min = max(out_dim, in_dim), min(out_dim, in_dim)
    a = jax.random.normal(key, (n_max, n_min), dtype=jnp.float32)
    q, r = jnp.linalg.qr(a)
    q = q * jnp.sign(jnp.diagonal(r))
    if out_dim < in_dim:
        q = q.T
    return gain * q[:out_dim, :in_dim]


def init_actor_params(key, actor_input_dim, task_emb_dim, actor_hiddens,
                      actor_output_dim):
    assert len(actor_hiddens) == 2, "fused kernel covers the [H, H2] config"
    H, H2 = actor_hiddens
    A = actor_output_dim
    assert max(3 * H, H2, A) <= LANE, "fused kernel assumes hidden/action <= 128"
    D = actor_input_dim + task_emb_dim
    gain = 2.0 ** 0.5
    keys = jax.random.split(key, 8)

    # input_fc: Linear(D, H); PyTorch weight is (out, in) -> split the in-dim
    # (inputs | task_emb) and store (in, out).
    w_in_pt = _orthogonal(keys[0], H, D, gain)
    wia = w_in_pt[:, :actor_input_dim].T                # (d_obs, H)
    wib = w_in_pt[:, actor_input_dim:].T                # (d_emb, H)

    # GRUCell(H, H): default U(-k, k), k = 1/sqrt(H); PyTorch gate order r,z,n.
    k = 1.0 / (H ** 0.5)
    w_ih = jax.random.uniform(keys[1], (3 * H, H), jnp.float32, -k, k)
    w_hh = jax.random.uniform(keys[2], (3 * H, H), jnp.float32, -k, k)
    b_ih = jax.random.uniform(keys[3], (3 * H,), jnp.float32, -k, k)
    b_hh = jax.random.uniform(keys[4], (3 * H,), jnp.float32, -k, k)
    w_ih_all = w_ih.T                                   # (H, 3H), cols [r|z|n]
    w_hh_all = w_hh.T                                   # (H, 3H)

    # output_fc: Linear(H, H2) + ReLU + Linear(H2, A).
    w2 = _orthogonal(keys[5], H2, H, gain).T            # (H, H2)
    w3 = _orthogonal(keys[6], A, H2, gain).T            # (H2, A)

    # ---- pack everything into one (R, 128) slab; sections 8-row aligned ----
    offs, cur = {}, 0

    def alloc(name, nrows):
        nonlocal cur
        offs[name] = cur
        cur += _round_up(nrows, 8)

    alloc("wia", actor_input_dim)
    alloc("wib", task_emb_dim)
    alloc("wih", LANE)     # (128,128): rows 0:H real (x1 pad lanes are 0 anyway)
    alloc("whh", H)
    alloc("w2", H)
    alloc("w3", LANE)      # (128,128): rows 0:H2, cols 0:A real; pad cols zero
    alloc("eye", H)        # identity embed H -> 128 lanes for the h_new store
    alloc("bias", 8)       # rows: 0=b_in 1=b_ih(GRU) 2=b_hh(GRU) 3=b2 4=b3(padded)

    slab = jnp.zeros((cur, LANE), jnp.float32)
    slab = slab.at[offs["wia"]:offs["wia"] + actor_input_dim, :H].set(wia)
    slab = slab.at[offs["wib"]:offs["wib"] + task_emb_dim, :H].set(wib)
    slab = slab.at[offs["wih"]:offs["wih"] + H, :3 * H].set(w_ih_all)
    slab = slab.at[offs["whh"]:offs["whh"] + H, :3 * H].set(w_hh_all)
    slab = slab.at[offs["w2"]:offs["w2"] + H, :H2].set(w2)
    slab = slab.at[offs["w3"]:offs["w3"] + H2, :A].set(w3)
    slab = slab.at[offs["eye"]:offs["eye"] + H, :H].set(jnp.eye(H, dtype=jnp.float32))
    b = offs["bias"]
    # b_in / b2 / b3[:A] are zero per the module's init; GRU biases are sampled.
    slab = slab.at[b + 1, :3 * H].set(b_ih)
    slab = slab.at[b + 2, :3 * H].set(b_hh)
    slab = slab.at[b + 4, A:].set(jnp.full((LANE - A,), _NEG, jnp.float32))

    return dict(slab=slab, offs=offs, H=H, H2=H2, num_actions=A,
                d_obs=actor_input_dim, d_emb=task_emb_dim)


def init_hidden(params, batch_size=1):
    return jnp.zeros((batch_size, params["H"]), jnp.float32)


# --------------------------------------------------------------------------
# Actor API (act / evaluate_actions / evaluate_policy_distribution)
# --------------------------------------------------------------------------
def act(inputs, task_emb, hiddens, params, *, deterministic=False, key=None):
    log_probs, h_new = actor_forward(inputs, task_emb, hiddens, params)
    if deterministic:
        action = jnp.argmax(log_probs, axis=-1)          # dist.mode()
    else:
        # Gumbel-max categorical sample (argmax invariant to log-softmax shift)
        g = -jnp.log(-jnp.log(jax.random.uniform(key, log_probs.shape) + 1e-20) + 1e-20)
        action = jnp.argmax(log_probs + g, axis=-1)
    return action[..., None], h_new


def evaluate_actions(inputs, task_emb, hiddens, action, params):
    log_probs, h_new = actor_forward(inputs, task_emb, hiddens, params)
    a = jnp.asarray(action).reshape(log_probs.shape[0]).astype(jnp.int32)
    action_log_probs = jnp.take_along_axis(log_probs, a[:, None], axis=-1)
    probs = jnp.exp(log_probs)
    dist_entropy = jnp.mean(-jnp.sum(probs * log_probs, axis=-1))
    return action_log_probs, dist_entropy, h_new


def evaluate_policy_distribution(inputs, task_emb, hiddens, params):
    log_probs, h_new = actor_forward(inputs, task_emb, hiddens, params)
    return jnp.squeeze(log_probs), h_new


# --------------------------------------------------------------------------
if __name__ == "__main__":
    batch = 8
    actor_input_dim = 20
    task_emb_dim = 12
    actor_output_dim = 7
    actor_hiddens = [32, 32]

    key = jax.random.PRNGKey(0)
    k_params, k_in, k_emb, k_h, k_sample = jax.random.split(key, 5)

    params = init_actor_params(k_params, actor_input_dim, task_emb_dim,
                               actor_hiddens, actor_output_dim)

    inputs = jax.random.normal(k_in, (batch, actor_input_dim), jnp.float32)
    task_emb = jax.random.normal(k_emb, (batch, task_emb_dim), jnp.float32)
    hiddens = jax.random.normal(k_h, (batch, actor_hiddens[0]), jnp.float32)

    # act (mode / sample), evaluate_actions, evaluate_policy_distribution
    action_det, h1 = act(inputs, task_emb, hiddens, params, deterministic=True)
    action_smp, _ = act(inputs, task_emb, hiddens, params,
                        deterministic=False, key=k_sample)
    alp, ent, h2 = evaluate_actions(inputs, task_emb, hiddens, action_det, params)
    pol_logp, h3 = evaluate_policy_distribution(inputs, task_emb, hiddens, params)
    jax.block_until_ready((action_det, action_smp, alp, ent, pol_logp, h1, h2, h3))

    # pure-JAX reference of the same forward pass (weights read from the slab)
    def ref_forward(obs, emb, h, p):
        slab, o = p["slab"], p["offs"]
        H, H2, A = p["H"], p["H2"], p["num_actions"]
        d_obs, d_emb = obs.shape[-1], emb.shape[-1]
        wia = slab[o["wia"]:o["wia"] + d_obs, :H]
        wib = slab[o["wib"]:o["wib"] + d_emb, :H]
        wih = slab[o["wih"]:o["wih"] + H, :3 * H]
        whh = slab[o["whh"]:o["whh"] + H, :3 * H]
        w2 = slab[o["w2"]:o["w2"] + H, :H2]
        w3 = slab[o["w3"]:o["w3"] + H2, :A]
        b = o["bias"]
        b_in, b_i, b_h = slab[b, :H], slab[b + 1, :3 * H], slab[b + 2, :3 * H]
        b2, b3 = slab[b + 3, :H2], slab[b + 4, :A]
        x1 = jnp.maximum(obs @ wia + emb @ wib + b_in, 0.0)
        gi = x1 @ wih + b_i
        gh = h @ whh + b_h
        r = jax.nn.sigmoid(gi[:, :H] + gh[:, :H])
        z = jax.nn.sigmoid(gi[:, H:2 * H] + gh[:, H:2 * H])
        n = jnp.tanh(gi[:, 2 * H:] + r * gh[:, 2 * H:])
        hn = (1.0 - z) * n + z * h
        x2 = jnp.maximum(hn @ w2 + b2, 0.0)
        logits = x2 @ w3 + b3
        return jax.nn.log_softmax(logits, axis=-1), hn

    logp_k, h_k = actor_forward(inputs, task_emb, hiddens, params)
    logp_r, h_r = ref_forward(inputs, task_emb, hiddens, params)
    assert logp_k.shape == (batch, actor_output_dim)
    assert h_k.shape == (batch, actor_hiddens[0])
    assert jnp.allclose(logp_k, logp_r, atol=1e-4), "log_probs mismatch"
    assert jnp.allclose(h_k, h_r, atol=1e-4), "hidden state mismatch"

    # >2-D hidden-shape branch (module reshapes to (-1, H) and views back)
    hid3 = hiddens.reshape(2, 4, actor_hiddens[0])
    in3 = inputs.reshape(2, 4, actor_input_dim)
    emb3 = task_emb.reshape(2, 4, task_emb_dim)
    logp3, h3d = actor_forward(in3, emb3, hid3, params)
    assert logp3.shape == (2, 4, actor_output_dim)
    assert h3d.shape == (2, 4, actor_hiddens[0])
    assert jnp.allclose(h3d.reshape(-1, actor_hiddens[0]), h_r, atol=1e-4)
    jax.block_until_ready((logp3, h3d))

    print("KERNEL_OK")
</pallas_src>

<mosaic_0001>
module attributes {stable_mosaic.version = 11 : i64} {
  func.func @_actor_kernel(%arg0: i32, %arg1: memref<8x20xf32, #tpu.memory_space<vmem>>, %arg2: memref<8x12xf32, #tpu.memory_space<vmem>>, %arg3: memref<8x32xf32, #tpu.memory_space<vmem>>, %arg4: memref<400x128xf32, #tpu.memory_space<vmem>>, %arg5: memref<8x128xf32, #tpu.memory_space<vmem>>, %arg6: memref<8x128xf32, #tpu.memory_space<vmem>>) attributes {dimension_semantics = [#tpu.dimension_semantics<parallel>], iteration_bounds = array<i64: 1>, scalar_prefetch = 0 : i64, scratch_operands = 0 : i64, tpu.core_type = #tpu.core_type<tc>, window_params = [{transform_indices = @transform_0, window_bounds = array<i64: 8, 20>}, {transform_indices = @transform_1, window_bounds = array<i64: 8, 12>}, {transform_indices = @transform_2, window_bounds = array<i64: 8, 32>}, {pipeline_mode = #tpu.pipeline_mode<synchronous>, transform_indices = @transform_3, window_bounds = array<i64: 400, 128>}, {transform_indices = @transform_4, window_bounds = array<i64: 8, 128>}, {transform_indices = @transform_5, window_bounds = array<i64: 8, 128>}]} {
    %c0 = arith.constant 0 : index
    %c0_0 = arith.constant 0 : index
    %0 = vector.load %arg1[%c0, %c0_0] : memref<8x20xf32, #tpu.memory_space<vmem>>, vector<8x20xf32>
    %c0_1 = arith.constant 0 : index
    %c0_2 = arith.constant 0 : index
    %1 = vector.load %arg2[%c0_1, %c0_2] : memref<8x12xf32, #tpu.memory_space<vmem>>, vector<8x12xf32>
    %c0_3 = arith.constant 0 : index
    %c0_4 = arith.constant 0 : index
    %2 = vector.load %arg3[%c0_3, %c0_4] : memref<8x32xf32, #tpu.memory_space<vmem>>, vector<8x32xf32>
    %c0_5 = arith.constant 0 : index
    %c0_6 = arith.constant 0 : index
    %3 = vector.load %arg4[%c0_5, %c0_6] : memref<400x128xf32, #tpu.memory_space<vmem>>, vector<20x128xf32>
    %cst = arith.constant dense<0.000000e+00> : vector<8x128xf32>
    %4 = tpu.matmul %0, %3, %cst {dimension_numbers = #tpu.dot_dimension_numbers<[1], [0], [0], [1], [0, 0, 1, 1], [], []>} : vector<8x20xf32>, vector<20x128xf32>, vector<8x128xf32> -> vector<8x128xf32>
    %c24 = arith.constant 24 : index
    %c0_7 = arith.constant 0 : index
    %5 = vector.load %arg4[%c24, %c0_7] : memref<400x128xf32, #tpu.memory_space<vmem>>, vector<12x128xf32>
    %cst_8 = arith.constant dense<0.000000e+00> : vector<8x128xf32>
    %6 = tpu.matmul %1, %5, %cst_8 {dimension_numbers = #tpu.dot_dimension_numbers<[1], [0], [0], [1], [0, 0, 1, 1], [], []>} : vector<8x12xf32>, vector<12x128xf32>, vector<8x128xf32> -> vector<8x128xf32>
    %7 = arith.addf %4, %6 : vector<8x128xf32>
    %c392 = arith.constant 392 : index
    %c0_9 = arith.constant 0 : index
    %8 = vector.load %arg4[%c392, %c0_9] : memref<400x128xf32, #tpu.memory_space<vmem>>, vector<1x128xf32>
    %9 = vector.broadcast %8 : vector<1x128xf32> to vector<8x128xf32>
    %10 = arith.addf %7, %9 : vector<8x128xf32>
    %cst_10 = arith.constant 0.000000e+00 : f32
    %11 = vector.broadcast %cst_10 : f32 to vector<8x128xf32>
    %12 = arith.maximumf %10, %11 : vector<8x128xf32>
    %c40 = arith.constant 40 : index
    %c0_11 = arith.constant 0 : index
    %13 = vector.load %arg4[%c40, %c0_11] : memref<400x128xf32, #tpu.memory_space<vmem>>, vector<128x128xf32>
    %cst_12 = arith.constant dense<0.000000e+00> : vector<8x128xf32>
    %14 = tpu.matmul %12, %13, %cst_12 {dimension_numbers = #tpu.dot_dimension_numbers<[1], [0], [0], [1], [0, 0, 1, 1], [], []>} : vector<8x128xf32>, vector<128x128xf32>, vector<8x128xf32> -> vector<8x128xf32>
    %c393 = arith.constant 393 : index
    %c0_13 = arith.constant 0 : index
    %15 = vector.load %arg4[%c393, %c0_13] : memref<400x128xf32, #tpu.memory_space<vmem>>, vector<1x128xf32>
    %16 = vector.broadcast %15 : vector<1x128xf32> to vector<8x128xf32>
    %17 = arith.addf %14, %16 : vector<8x128xf32>
    %c168 = arith.constant 168 : index
    %c0_14 = arith.constant 0 : index
    %18 = vector.load %arg4[%c168, %c0_14] : memref<400x128xf32, #tpu.memory_space<vmem>>, vector<32x128xf32>
    %cst_15 = arith.constant dense<0.000000e+00> : vector<8x128xf32>
    %19 = tpu.matmul %2, %18, %cst_15 {dimension_numbers = #tpu.dot_dimension_numbers<[1], [0], [0], [1], [0, 0, 1, 1], [], []>} : vector<8x32xf32>, vector<32x128xf32>, vector<8x128xf32> -> vector<8x128xf32>
    %c394 = arith.constant 394 : index
    %c0_16 = arith.constant 0 : index
    %20 = vector.load %arg4[%c394, %c0_16] : memref<400x128xf32, #tpu.memory_space<vmem>>, vector<1x128xf32>
    %21 = vector.broadcast %20 : vector<1x128xf32> to vector<8x128xf32>
    %22 = arith.addf %19, %21 : vector<8x128xf32>
    %23 = vector.extract_strided_slice %17 {offsets = [0, 0], sizes = [8, 32], strides = [1, 1]} : vector<8x128xf32> to vector<8x32xf32>
    %24 = vector.extract_strided_slice %22 {offsets = [0, 0], sizes = [8, 32], strides = [1, 1]} : vector<8x128xf32> to vector<8x32xf32>
    %25 = arith.addf %23, %24 : vector<8x32xf32>
    %cst_17 = arith.constant 5.000000e-01 : f32
    %26 = vector.broadcast %cst_17 : f32 to vector<8x32xf32>
    %27 = arith.mulf %26, %25 : vector<8x32xf32>
    %28 = math.tanh %27 : vector<8x32xf32>
    %cst_18 = arith.constant 1.000000e+00 : f32
    %29 = vector.broadcast %cst_18 : f32 to vector<8x32xf32>
    %30 = arith.addf %28, %29 : vector<8x32xf32>
    %cst_19 = arith.constant 5.000000e-01 : f32
    %31 = vector.broadcast %cst_19 : f32 to vector<8x32xf32>
    %32 = arith.mulf %31, %30 : vector<8x32xf32>
    %33 = vector.extract_strided_slice %17 {offsets = [0, 32], sizes = [8, 32], strides = [1, 1]} : vector<8x128xf32> to vector<8x32xf32>
    %34 = vector.extract_strided_slice %22 {offsets = [0, 32], sizes = [8, 32], strides = [1, 1]} : vector<8x128xf32> to vector<8x32xf32>
    %35 = arith.addf %33, %34 : vector<8x32xf32>
    %cst_20 = arith.constant 5.000000e-01 : f32
    %36 = vector.broadcast %cst_20 : f32 to vector<8x32xf32>
    %37 = arith.mulf %36, %35 : vector<8x32xf32>
    %38 = math.tanh %37 : vector<8x32xf32>
    %cst_21 = arith.constant 1.000000e+00 : f32
    %39 = vector.broadcast %cst_21 : f32 to vector<8x32xf32>
    %40 = arith.addf %38, %39 : vector<8x32xf32>
    %cst_22 = arith.constant 5.000000e-01 : f32
    %41 = vector.broadcast %cst_22 : f32 to vector<8x32xf32>
    %42 = arith.mulf %41, %40 : vector<8x32xf32>
    %43 = vector.extract_strided_slice %17 {offsets = [0, 64], sizes = [8, 32], strides = [1, 1]} : vector<8x128xf32> to vector<8x32xf32>
    %44 = vector.extract_strided_slice %22 {offsets = [0, 64], sizes = [8, 32], strides = [1, 1]} : vector<8x128xf32> to vector<8x32xf32>
    %45 = arith.mulf %32, %44 : vector<8x32xf32>
    %46 = arith.addf %43, %45 : vector<8x32xf32>
    %47 = math.tanh %46 : vector<8x32xf32>
    %cst_23 = arith.constant 1.000000e+00 : f32
    %48 = vector.broadcast %cst_23 : f32 to vector<8x32xf32>
    %49 = arith.subf %48, %42 : vector<8x32xf32>
    %50 = arith.mulf %49, %47 : vector<8x32xf32>
    %51 = arith.mulf %42, %2 : vector<8x32xf32>
    %52 = arith.addf %50, %51 : vector<8x32xf32>
    %c360 = arith.constant 360 : index
    %c0_24 = arith.constant 0 : index
    %53 = vector.load %arg4[%c360, %c0_24] : memref<400x128xf32, #tpu.memory_space<vmem>>, vector<32x128xf32>
    %cst_25 = arith.constant dense<0.000000e+00> : vector<8x128xf32>
    %54 = tpu.matmul %52, %53, %cst_25 {dimension_numbers = #tpu.dot_dimension_numbers<[1], [0], [0], [1], [0, 0, 1, 1], [], []>} : vector<8x32xf32>, vector<32x128xf32>, vector<8x128xf32> -> vector<8x128xf32>
    %c0_26 = arith.constant 0 : index
    %c0_27 = arith.constant 0 : index
    %55 = vector.load %arg6[%c0_26, %c0_27] : memref<8x128xf32, #tpu.memory_space<vmem>>, vector<8x128xf32>
    tpu.vector_store %arg6[%c0_26, %c0_27], %54 {strides = array<i32>} : memref<8x128xf32, #tpu.memory_space<vmem>>, vector<8x128xf32>,
    %c200 = arith.constant 200 : index
    %c0_28 = arith.constant 0 : index
    %56 = vector.load %arg4[%c200, %c0_28] : memref<400x128xf32, #tpu.memory_space<vmem>>, vector<32x128xf32>
    %cst_29 = arith.constant dense<0.000000e+00> : vector<8x128xf32>
    %57 = tpu.matmul %52, %56, %cst_29 {dimension_numbers = #tpu.dot_dimension_numbers<[1], [0], [0], [1], [0, 0, 1, 1], [], []>} : vector<8x32xf32>, vector<32x128xf32>, vector<8x128xf32> -> vector<8x128xf32>
    %c395 = arith.constant 395 : index
    %c0_30 = arith.constant 0 : index
    %58 = vector.load %arg4[%c395, %c0_30] : memref<400x128xf32, #tpu.memory_space<vmem>>, vector<1x128xf32>
    %59 = vector.broadcast %58 : vector<1x128xf32> to vector<8x128xf32>
    %60 = arith.addf %57, %59 : vector<8x128xf32>
    %cst_31 = arith.constant 0.000000e+00 : f32
    %61 = vector.broadcast %cst_31 : f32 to vector<8x128xf32>
    %62 = arith.maximumf %60, %61 : vector<8x128xf32>
    %c232 = arith.constant 232 : index
    %c0_32 = arith.constant 0 : index
    %63 = vector.load %arg4[%c232, %c0_32] : memref<400x128xf32, #tpu.memory_space<vmem>>, vector<128x128xf32>
    %cst_33 = arith.constant dense<0.000000e+00> : vector<8x128xf32>
    %64 = tpu.matmul %62, %63, %cst_33 {dimension_numbers = #tpu.dot_dimension_numbers<[1], [0], [0], [1], [0, 0, 1, 1], [], []>} : vector<8x128xf32>, vector<128x128xf32>, vector<8x128xf32> -> vector<8x128xf32>
    %c396 = arith.constant 396 : index
    %c0_34 = arith.constant 0 : index
    %65 = vector.load %arg4[%c396, %c0_34] : memref<400x128xf32, #tpu.memory_space<vmem>>, vector<1x128xf32>
    %66 = vector.broadcast %65 : vector<1x128xf32> to vector<8x128xf32>
    %67 = arith.addf %64, %66 : vector<8x128xf32>
    %cst_35 = arith.constant dense<0xFF800000> : vector<8xf32>
    %68 = vector.multi_reduction <maximumf>, %67, %cst_35 [1] : vector<8x128xf32> to vector<8xf32>
    %69 = vector.shape_cast %68 : vector<8xf32> to vector<8x1xf32>
    %70 = vector.broadcast %69 : vector<8x1xf32> to vector<8x128xf32>
    %71 = arith.subf %67, %70 : vector<8x128xf32>
    %72 = math.exp %71 : vector<8x128xf32>
    %cst_36 = arith.constant dense<0.000000e+00> : vector<8xf32>
    %73 = vector.multi_reduction <add>, %72, %cst_36 [1] : vector<8x128xf32> to vector<8xf32>
    %74 = vector.shape_cast %73 : vector<8xf32> to vector<8x1xf32>
    %75 = math.log %74 : vector<8x1xf32>
    %76 = vector.broadcast %75 : vector<8x1xf32> to vector<8x128xf32>
    %77 = arith.subf %71, %76 : vector<8x128xf32>
    %c0_37 = arith.constant 0 : index
    %c0_38 = arith.constant 0 : index
    %78 = vector.load %arg5[%c0_37, %c0_38] : memref<8x128xf32, #tpu.memory_space<vmem>>, vector<8x128xf32>
    tpu.vector_store %arg5[%c0_37, %c0_38], %77 {strides = array<i32>} : memref<8x128xf32, #tpu.memory_space<vmem>>, vector<8x128xf32>,
    return
  }
  func.func @transform_0(%arg0: i32) -> (i32, i32) {
    %c0_i32 = arith.constant 0 : i32
    %c0_i32_0 = arith.constant 0 : i32
    return %arg0, %c0_i32 : i32, i32
  }
  func.func @transform_1(%arg0: i32) -> (i32, i32) {
    %c0_i32 = arith.constant 0 : i32
    %c0_i32_0 = arith.constant 0 : i32
    return %arg0, %c0_i32 : i32, i32
  }
  func.func @transform_2(%arg0: i32) -> (i32, i32) {
    %c0_i32 = arith.constant 0 : i32
    %c0_i32_0 = arith.constant 0 : i32
    return %arg0, %c0_i32 : i32, i32
  }
  func.func @transform_3(%arg0: i32) -> (i32, i32) {
    %c0_i32 = arith.constant 0 : i32
    %c0_i32_0 = arith.constant 0 : i32
    %c0_i32_1 = arith.constant 0 : i32
    return %c0_i32, %c0_i32_0 : i32, i32
  }
  func.func @transform_4(%arg0: i32) -> (i32, i32) {
    %c0_i32 = arith.constant 0 : i32
    %c0_i32_0 = arith.constant 0 : i32
    return %arg0, %c0_i32 : i32, i32
  }
  func.func @transform_5(%arg0: i32) -> (i32, i32) {
    %c0_i32 = arith.constant 0 : i32
    %c0_i32_0 = arith.constant 0 : i32
    return %arg0, %c0_i32 : i32, i32
  }
}

</mosaic_0001>

<bundles_post_ra>
// kernel: tpu_custom_call.1
= control target key start
LH: loop header
LB: loop body
LE: loop exit
PB: predicated region body
PF: predicated region fallthrough
CT: control target
= control target key end

     0   :  { %11 = vsyncpa [#allocation3], 0  ;;  %s1199_s0 = inlined_call_operand.hbm [shape: f32[8,20], index: 0, kind: input, shape index: {}]   ;;  %s1200_s1 = inlined_call_operand.hbm [shape: f32[8,12], index: 1, kind: input, shape index: {}]   ;;  %s1201_s2 = inlined_call_operand.hbm [shape: f32[8,32], index: 2, kind: input, shape index: {}]   ;;  %s1202_s3 = inlined_call_operand.hbm [shape: f32[400,128], index: 3, kind: input, shape index: {}]   ;;  %s1203_s4 = inlined_call_operand.hbm [shape: f32[8,128], index: 4, kind: output, shape index: {0}]   ;;  %s1204_s5 = inlined_call_operand.hbm [shape: f32[8,128], index: 5, kind: output, shape index: {1}]  }
   0x1   :  { %12 = vsyncpa [#allocation6], 0 }
   0x2   :  { %13 = vsyncpa [#allocation9], 0 }
   0x3   :  { %14 = vsyncpa [#allocation4], 0 }
   0x4   :  { %15 = vsyncpa [#allocation12], 0  ;;  %s1072_s18 = smov [#allocation5]   ;;  %s1073_s20 = smov [#allocation2]  }
   0x5   :  { %s32_s19 = sshll.u32 %s1072_s18, 4  ;;  %s22_s21 = sshll.u32 %s1073_s20, 4  ;;  %s33_s19 = int_to_ptr.vmem [resolvable:$true] %s32_s19  ;;  %s23_s21 = int_to_ptr.vmem [resolvable:$true] %s22_s21 }
   0x6   :  { %s950_s22 = scalar_lea.vmem %s33_s19, 128  ;;  %p955_p1 = scmp.lt.s32.totalorder %s33_s19, %s33_s19 }
   0x7   :  { %p951_p0 = scmp.ne.s32.totalorder %s33_s19, %s950_s22  ;;  %p956_p2 = scmp.lt.s32.totalorder %s950_s22, %s950_s22 }
   0x9   :  { %p957_p3 = por %p956_p2, %p955_p1 }
   0xb   :  { %p958_p4 = pnand %p957_p3, %p951_p0 }
   0xd   :  { %961 = shalt.err (!%p958_p4)
}
   0xe   :  { %35 = dma.hbm_to_vmem [thread:$0]  %s1200_s1, 128, %s33_s19, [#allocation6]  }
   0xf   :  { %s970_s25 = scalar_lea.vmem %s23_s21, 128  ;;  %p975_p6 = scmp.lt.s32.totalorder %s23_s21, %s23_s21 }
  0x10   :  { %p971_p5 = scmp.ne.s32.totalorder %s23_s21, %s970_s25  ;;  %p976_p7 = scmp.lt.s32.totalorder %s970_s25, %s970_s25 }
  0x12   :  { %p977_p8 = por %p976_p7, %p975_p6 }
  0x14   :  { %p978_p9 = pnand %p977_p8, %p971_p5 }
  0x16   :  { %981 = shalt.err (!%p978_p9)
}
  0x17   :  { %25 = dma.hbm_to_vmem [thread:$0]  %s1199_s0, 128, %s23_s21, [#allocation3]  }
  0x18   :  { %s1074_s28 = smov [#allocation7]   ;;  %s1075_s30 = smov [#allocation8]  }
  0x19   :  { %s42_s29 = sshll.u32 %s1074_s28, 4  ;;  %s51_s6 = sshll.u32 %s1075_s30, 4  ;;  %s43_s29 = int_to_ptr.vmem [resolvable:$true] %s42_s29  ;;  %s52_s6 = int_to_ptr.vmem [resolvable:$true] %s51_s6 }
  0x1a   :  { %s990_s7 = scalar_lea.vmem %s43_s29, 128  ;;  %p995_p11 = scmp.lt.s32.totalorder %s43_s29, %s43_s29 }
  0x1b   :  { %p991_p10 = scmp.ne.s32.totalorder %s43_s29, %s990_s7  ;;  %p996_p12 = scmp.lt.s32.totalorder %s990_s7, %s990_s7 }
  0x1d   :  { %p997_p13 = por %p996_p12, %p995_p11 }
  0x1f   :  { %p998_p0 = pnand %p997_p13, %p991_p10 }
  0x21   :  { %1001 = shalt.err (!%p998_p0)
}
  0x22   :  { %45 = dma.hbm_to_vmem [thread:$0]  %s1201_s2, 128, %s43_s29, [#allocation6]  }
  0x23   :  { %s1010_s9 = scalar_lea.vmem %s52_s6, 6400  ;;  %p1015_p2 = scmp.lt.s32.totalorder %s52_s6, %s52_s6 }
  0x24   :  { %p1011_p1 = scmp.ne.s32.totalorder %s52_s6, %s1010_s9  ;;  %p1016_p3 = scmp.lt.s32.totalorder %s1010_s9, %s1010_s9 }
  0x26   :  { %p1017_p4 = por %p1016_p3, %p1015_p2 }
  0x28   :  { %p1018_p5 = pnand %p1017_p4, %p1011_p1 }
  0x2a   :  { %1021 = shalt.err (!%p1018_p5)
}
  0x2b   :  { %s1076_s0 = smov 128   ;;  %s1077_s10 = smov 8  }
  0x2c   :  { %57 = dma.hbm_to_vmem [thread:$0]  %s1202_s3, 6400, %s52_s6, [#allocation9], %s1076_s0, %s1076_s0, %s1077_s10  }
  0x2d   :  { %1062 = dma.done.wait [#allocation3], 128  }
  0x2e   :  { %1063 = vsyncadd [#allocation3], 4294967168 }
  0x2f   :  { %1064 = dma.done.wait [#allocation6], 256  }
  0x30   :  { %1065 = vsyncadd [#allocation6], 4294967040 }
  0x31   :  { %1066 = dma.done.wait [#allocation9], 6400  }
  0x32   :  { %1067 = vsyncadd [#allocation9], 4294960896  ;;  %v1078_v0 = vmov 0.0   ;;  %vm1079_vm0 = vmmov 0   ;;  %vm82_vm1 = vcmask 1043456   ;;  %v76_v2 = vld [vmem:[#allocation8 + $0x18] sm:$0xff] }
  0x33   :  { %802 = vmatprep.subr.mxu0 %v1078_v0  ;;  %806 = vmatprep.mubr.msk.f32.mxu0 %vm1079_vm0, %v1078_v0  ;;  %v77_v1 = vld [vmem:[#allocation8 + $0x20] sm:$0xf]  ;;  %v71_v3 = vld [vmem:[#allocation5] sm:$0xff]  ;;  %vm78_vm2 = vcmask 97280   ;;  %v74_v5 = vld [vmem:[#allocation8 + $0x8] sm:$0xff]  ;;  %vm156_vm3 = vcmask 162816  }
  0x34   :  { %864 = vmatprep.subr.mxu1 %v1078_v0  ;;  %872 = vmatprep.mubr.msk.f32.mxu1 %vm1079_vm0, %v1078_v0  ;;  %v75_v4 = vld [vmem:[#allocation8 + $0x10] sm:$0xf]  ;;  %v73_v6 = vld [vmem:[#allocation8] sm:$0xff]  ;;  %v70_v7 = vld [vmem:[#allocation2] sm:$0xff]  ;;  %vm340_vm4 = vcmask 261120   ;;  %s1080_s2 = smov 64  }
  0x35   :  { %803 = vmatpush3.msk.msra.mxu0 %vm82_vm1, %v77_v1  ;;  %v255_v8 = vld [vmem:[#allocation8 + $0xa0] sm:$0xff]  ;;  %v254_v9 = vld [vmem:[#allocation8 + $0x98] sm:$0xff]  ;;  %v253_v10 = vld [vmem:[#allocation8 + $0x90] sm:$0xff]  ;;  %s1081_s3 = smov 96   ;;  %s1082_s13 = smov 32  }
  0x36   :  { %804 = vmatprep.subr.mxu0 %v1078_v0  ;;  %v252_v11 = vld [vmem:[#allocation8 + $0x88] sm:$0xff]  ;;  %v251_v12 = vld [vmem:[#allocation8 + $0x80] sm:$0xff]  ;;  %v250_v13 = vld [vmem:[#allocation8 + $0x78] sm:$0xff]  ;;  %s1083_s14 = smov [#allocation11]  }
  0x37   :  { %805 = vmatpush3.msra.mxu0 %v76_v2  ;;  %v249_v14 = vld [vmem:[#allocation8 + $0x70] sm:$0xff]  ;;  %v248_v15 = vld [vmem:[#allocation8 + $0x68] sm:$0xff]  ;;  %v247_v16 = vld [vmem:[#allocation8 + $0x60] sm:$0xff]  ;;  %s719_s15 = sshll.u32 %s1083_s14, 4  ;;  %s720_s15 = int_to_ptr.vmem [resolvable:$true] %s719_s15 }
  0x38   :  { %807 = vmatmul.mubr.msk.f32.vlgmr.msra.gmra.mxu0 %vm78_vm2, %v71_v3  ;;  %809 = vmatprep.subr.mxu0 %v1078_v0  ;;  %v246_v17 = vld [vmem:[#allocation8 + $0x58] sm:$0xff]  ;;  %v245_v18 = vld [vmem:[#allocation8 + $0x50] sm:$0xff]  ;;  %v244_v19 = vld [vmem:[#allocation8 + $0x48] sm:$0xff]  ;;  %s1022_s16 = scalar_lea.vmem %s720_s15, 128  ;;  %p1027_p7 = scmp.lt.s32.totalorder %s720_s15, %s720_s15 }
  0x39   :  { %810 = vmatpush3.msk.msra.mxu0 %vm82_vm1, %v75_v4  ;;  %815 = vmatprep.mubr.msk.f32.mxu0 %vm1079_vm0, %v1078_v0  ;;  %v243_v20 = vld [vmem:[#allocation8 + $0x40] sm:$0xff]  ;;  %v242_v21 = vld [vmem:[#allocation8 + $0x38] sm:$0xff]  ;;  %v241_v22 = vld [vmem:[#allocation8 + $0x30] sm:$0xff]  ;;  %p1023_p6 = scmp.ne.s32.totalorder %s720_s15, %s1022_s16  ;;  %p1028_p8 = scmp.lt.s32.totalorder %s1022_s16, %s1022_s16 }
  0x3a   :  { %811 = vmatprep.subr.mxu0 %v1078_v0  ;;  %v240_v23 = vld [vmem:[#allocation8 + $0x28] sm:$0xff]  ;;  %v334_v32 = vld [vmem:[#allocation8 + $0xc0] sm:$0xff]  ;;  %v333_v33 = vld [vmem:[#allocation8 + $0xb8] sm:$0xff] }
  0x3b   :  { %812 = vmatpush3.msra.mxu0 %v74_v5  ;;  %v738_v27 = vld [vmem:[#allocation8 + $0x188] ss:$0 sm:$0xff]  ;;  %v332_v34 = vld [vmem:[#allocation8 + $0xb0] sm:$0xff]  ;;  %v72_v36 = vld [vmem:[#allocation7] sm:$0xff]  ;;  %p1029_p9 = por %p1028_p8, %p1027_p7 }
  0x3c   :  { %813 = vmatprep.subr.mxu0 %v1078_v0  ;;  %v331_v35 = vld [vmem:[#allocation8 + $0xa8] sm:$0xff]  ;;  %v444_v54 = vld [vmem:[#allocation8 + $0x180] sm:$0xff]  ;;  %v443_v55 = vld [vmem:[#allocation8 + $0x178] sm:$0xff] }
  0x3d   :  { %814 = vmatpush3.msra.mxu0 %v73_v6  ;;  %v740_v39 = vld [vmem:[#allocation8 + $0x18a] ss:$0 sm:$0xff]  ;;  %v739_v43 = vld [vmem:[#allocation8 + $0x189] ss:$0 sm:$0xff]  ;;  %865 = vmatpush3.msra.mxu1 %v444_v54  ;;  %v442_v56 = vld [vmem:[#allocation8 + $0x170] sm:$0xff]  ;;  %p1030_p10 = pnand %p1029_p9, %p1023_p6 }
  0x3e   :  { %816 = vmatmul.mubr.msk.f32.vlgmr.msra.gmra.mxu0 %vm156_vm3, %v70_v7  ;;  %818 = vmatprep.subr.mxu0 %v1078_v0  ;;  %v441_v58 = vld [vmem:[#allocation8 + $0x168] sm:$0xff]  ;;  %v524_v2 = vld [vmem:[#allocation8 + $0xe0] sm:$0xff]  ;;  %v523_v4 = vld [vmem:[#allocation8 + $0xd8] sm:$0xff] }
  0x3f   :  { %819 = vmatpush3.msra.mxu0 %v255_v8  ;;  %850 = vmatprep.mubr.msk.f32.mxu0 %vm1079_vm0, %v1078_v0  ;;  %v522_v5 = vld [vmem:[#allocation8 + $0xd0] sm:$0xff]  ;;  %v521_v6 = vld [vmem:[#allocation8 + $0xc8] sm:$0xff]  ;;  %v616_v7 = vld [vmem:[#allocation8 + $0x160] sm:$0xff] }
  0x40   :  { %820 = vmatprep.subr.mxu0 %v1078_v0  ;;  %866 = vmatprep.subr.mxu1 %v1078_v0  ;;  %v615_v8 = vld [vmem:[#allocation8 + $0x158] sm:$0xff] }
  0x41   :  { %821 = vmatpush3.msra.mxu0 %v254_v9  ;;  %867 = vmatpush3.msra.mxu1 %v443_v55  ;;  %v614_v9 = vld [vmem:[#allocation8 + $0x150] sm:$0xff] }
  0x42   :  { %822 = vmatprep.subr.mxu0 %v1078_v0  ;;  %868 = vmatprep.subr.mxu1 %v1078_v0 }
  0x43   :  { %823 = vmatpush3.msra.mxu0 %v253_v10  ;;  %869 = vmatpush3.msra.mxu1 %v442_v56  ;;  %v613_v10 = vld [vmem:[#allocation8 + $0x148] sm:$0xff] }
  0x44   :  { %824 = vmatprep.subr.mxu0 %v1078_v0  ;;  %870 = vmatprep.subr.mxu1 %v1078_v0 }
  0x45   :  { %825 = vmatpush3.msra.mxu0 %v252_v11  ;;  %871 = vmatpush3.msra.mxu1 %v441_v58  ;;  %v612_v11 = vld [vmem:[#allocation8 + $0x140] sm:$0xff] }
  0x46   :  { %826 = vmatprep.subr.mxu0 %v1078_v0  ;;  %875 = vmatprep.subr.mxu1 %v1078_v0 }
  0x47   :  { %827 = vmatpush3.msra.mxu0 %v251_v12  ;;  %v611_v12 = vld [vmem:[#allocation8 + $0x138] sm:$0xff] }
  0x48   :  { %828 = vmatprep.subr.mxu0 %v1078_v0 }
  0x49   :  { %829 = vmatpush3.msra.mxu0 %v250_v13  ;;  %v610_v13 = vld [vmem:[#allocation8 + $0x130] sm:$0xff] }
  0x4a   :  { %830 = vmatprep.subr.mxu0 %v1078_v0 }
  0x4b   :  { %831 = vmatpush3.msra.mxu0 %v249_v14  ;;  %v609_v14 = vld [vmem:[#allocation8 + $0x128] sm:$0xff] }
  0x4c   :  { %832 = vmatprep.subr.mxu0 %v1078_v0 }
  0x4d   :  { %833 = vmatpush3.msra.mxu0 %v248_v15  ;;  %v608_v15 = vld [vmem:[#allocation8 + $0x120] sm:$0xff] }
  0x4e   :  { %834 = vmatprep.subr.mxu0 %v1078_v0 }
  0x4f   :  { %835 = vmatpush3.msra.mxu0 %v247_v16  ;;  %v607_v16 = vld [vmem:[#allocation8 + $0x118] sm:$0xff] }
  0x50   :  { %836 = vmatprep.subr.mxu0 %v1078_v0 }
  0x51   :  { %837 = vmatpush3.msra.mxu0 %v246_v17  ;;  %v606_v17 = vld [vmem:[#allocation8 + $0x110] sm:$0xff] }
  0x52   :  { %838 = vmatprep.subr.mxu0 %v1078_v0 }
  0x53   :  { %839 = vmatpush3.msra.mxu0 %v245_v18  ;;  %v605_v18 = vld [vmem:[#allocation8 + $0x108] sm:$0xff] }
  0x54   :  { %840 = vmatprep.subr.mxu0 %v1078_v0 }
  0x55   :  { %841 = vmatpush3.msra.mxu0 %v244_v19  ;;  %v604_v19 = vld [vmem:[#allocation8 + $0x100] sm:$0xff] }
  0x56   :  { %842 = vmatprep.subr.mxu0 %v1078_v0 }
  0x57   :  { %843 = vmatpush3.msra.mxu0 %v243_v20  ;;  %v603_v20 = vld [vmem:[#allocation8 + $0xf8] sm:$0xff] }
  0x58   :  { %844 = vmatprep.subr.mxu0 %v1078_v0 }
  0x59   :  { %845 = vmatpush3.msra.mxu0 %v242_v21  ;;  %v602_v21 = vld [vmem:[#allocation8 + $0xf0] sm:$0xff] }
  0x5a   :  { %846 = vmatprep.subr.mxu0 %v1078_v0 }
  0x5b   :  { %847 = vmatpush3.msra.mxu0 %v241_v22  ;;  %v601_v22 = vld [vmem:[#allocation8 + $0xe8] sm:$0xff] }
  0x5c   :  { %848 = vmatprep.subr.mxu0 %v1078_v0 }
  0x5d   :  { %849 = vmatpush3.msra.mxu0 %v240_v23 }
  0x5e   :  { %853 = vmatprep.subr.mxu0 %v1078_v0 }
  0xf8   :  { %v152_v24 = vpop.f32.mrf.mxu0 }
  0xfa   :  { %v808_v25 = vpop.f32.mrf.mxu0 }
  0xfb   :  { %v743_v25 = vld [vmem:[#allocation8 + $0x18b] ss:$0 sm:$0xff] }
  0xfe   :  { %v229_v26 = vpop.f32.mrf.mxu0 }
  0xff   :  { %v230_v28 = vadd.f32 %v229_v26, %v152_v24 }
 0x100   :  { %v817_v29 = vpop.f32.mrf.mxu0 }
 0x101   :  { %v238_v30 = vadd.f32 %v738_v27, %v230_v28 }
 0x103   :  { %v239_v31 = vmax.f32 %v238_v30, 0.0  ;;  %v745_v30 = vld [vmem:[#allocation8 + $0x18c] ss:$0 sm:$0xff] }
 0x105   :  { %851 = vmatmul.mubr.f32.vlgmr.msra.gmra.mxu0 %v239_v31 }
 0x106   :  { %854 = vmatpush3.msra.mxu0 %v334_v32  ;;  %861 = vmatprep.mubr.msk.f32.mxu0 %vm1079_vm0, %v1078_v0 }
 0x107   :  { %855 = vmatprep.subr.mxu0 %v1078_v0 }
 0x108   :  { %856 = vmatpush3.msra.mxu0 %v333_v33 }
 0x109   :  { %857 = vmatprep.subr.mxu0 %v1078_v0 }
 0x10a   :  { %858 = vmatpush3.msra.mxu0 %v332_v34 }
 0x10b   :  { %859 = vmatprep.subr.mxu0 %v1078_v0 }
 0x10c   :  { %860 = vmatpush3.msra.mxu0 %v331_v35 }
 0x10d   :  { %862 = vmatmul.mubr.msk.f32.vlgmr.msra.gmra.mxu0 %vm340_vm4, %v72_v36 }
 0x1c5   :  { %v327_v37 = vpop.f32.mrf.mxu0 }
 0x1c6   :  { %v328_v44 = vadd.f32 %v739_v43, %v327_v37 }
 0x1c7   :  { %v852_v38 = vpop.f32.mrf.mxu0 }
 0x1cd   :  { %v410_v40 = vpop.f32.mrf.mxu0 }
 0x1ce   :  { %v411_v41 = vadd.f32 %v740_v39, %v410_v40 }
 0x1cf   :  { %v863_v42 = vpop.f32.mrf.mxu0 }
 0x1d0   :  { %420 = vrot.lane.b32.xlu0 %v411_v41, %s1080_s2  ;;  %v414_v45 = vadd.f32 %v411_v41, %v328_v44 }
 0x1d2   :  { %v415_v46 = vmul.f32 0.5, %v414_v45 }
 0x1d4   :  { %934 = vtanh.f32 %v415_v46 }
 0x1e1   :  { %v935_v47 = vpop.eup %934 }
 0x1e2   :  { %v417_v48 = vadd.f32 1.0, %v935_v47 }
 0x1e4   :  { %v418_v49 = vmul.f32 0.5, %v417_v48 }
 0x1e6   :  { %v430_v60 = vsub.f32 1.0, %v418_v49 }
 0x242   :  { %v421_v50 = vpop.permute.xlu0 %420 }
 0x243   :  { %v423_v51 = vmul.f32 %v421_v50, %v418_v49 }
 0x245   :  { %425 = vrot.lane.b32.xlu0 %v423_v51, %s1080_s2 }
 0x2b7   :  { %v426_v52 = vpop.permute.xlu0 %425 }
 0x2b8   :  { %v428_v53 = vadd.f32 %v426_v52, %v328_v44 }
 0x2ba   :  { %936 = vtanh.f32 %v428_v53 }
 0x2c7   :  { %v937_v57 = vpop.eup %936 }
 0x2c8   :  { %432 = vrot.lane.b32.xlu1 %v937_v57, %s1081_s3 }
 0x2cc   :  { %436 = vrot.lane.b32.xlu1 %v72_v36, %s1082_s13 }
 0x33a   :  { %v433_v59 = vpop.permute.xlu1 %432 }
 0x33b   :  { %v435_v62 = vmul.f32 %v433_v59, %v430_v60 }
 0x33e   :  { %v437_v61 = vpop.permute.xlu1 %436 }
 0x33f   :  { %v439_v63 = vmul.f32 %v437_v61, %v418_v49 }
 0x341   :  { %v440_v1 = vadd.f32 %v439_v63, %v435_v62 }
 0x343   :  { %446 = vrot.lane.b32.xlu0 %v440_v1, %s1081_s3 }
 0x3b5   :  { %v447_v3 = vpop.permute.xlu0 %446 }
 0x3b6   :  { %873 = vmatmul.mubr.msk.f32.vlgmr.msra.gmra.mxu1 %vm340_vm4, %v447_v3 }
 0x3b7   :  { %876 = vmatpush3.msra.mxu1 %v524_v2  ;;  %883 = vmatprep.mubr.msk.f32.mxu1 %vm1079_vm0, %v1078_v0 }
 0x3b8   :  { %877 = vmatprep.subr.mxu1 %v1078_v0 }
 0x3b9   :  { %878 = vmatpush3.msra.mxu1 %v523_v4 }
 0x3ba   :  { %879 = vmatprep.subr.mxu1 %v1078_v0 }
 0x3bb   :  { %880 = vmatpush3.msra.mxu1 %v522_v5 }
 0x3bc   :  { %881 = vmatprep.subr.mxu1 %v1078_v0 }
 0x3bd   :  { %882 = vmatpush3.msra.mxu1 %v521_v6 }
 0x3be   :  { %884 = vmatmul.mubr.msk.f32.vlgmr.msra.gmra.mxu1 %vm340_vm4, %v447_v3  ;;  %886 = vmatprep.subr.mxu1 %v1078_v0 }
 0x3bf   :  { %887 = vmatpush3.msra.mxu1 %v616_v7  ;;  %918 = vmatprep.mubr.msk.f32.mxu1 %vm1079_vm0, %v1078_v0 }
 0x3c0   :  { %888 = vmatprep.subr.mxu1 %v1078_v0 }
 0x3c1   :  { %889 = vmatpush3.msra.mxu1 %v615_v8 }
 0x3c2   :  { %890 = vmatprep.subr.mxu1 %v1078_v0 }
 0x3c3   :  { %891 = vmatpush3.msra.mxu1 %v614_v9 }
 0x3c4   :  { %892 = vmatprep.subr.mxu1 %v1078_v0 }
 0x3c5   :  { %893 = vmatpush3.msra.mxu1 %v613_v10 }
 0x3c6   :  { %894 = vmatprep.subr.mxu1 %v1078_v0 }
 0x3c7   :  { %895 = vmatpush3.msra.mxu1 %v612_v11 }
 0x3c8   :  { %896 = vmatprep.subr.mxu1 %v1078_v0 }
 0x3c9   :  { %897 = vmatpush3.msra.mxu1 %v611_v12 }
 0x3ca   :  { %898 = vmatprep.subr.mxu1 %v1078_v0 }
 0x3cb   :  { %899 = vmatpush3.msra.mxu1 %v610_v13 }
 0x3cc   :  { %900 = vmatprep.subr.mxu1 %v1078_v0 }
 0x3cd   :  { %901 = vmatpush3.msra.mxu1 %v609_v14 }
 0x3ce   :  { %902 = vmatprep.subr.mxu1 %v1078_v0 }
 0x3cf   :  { %903 = vmatpush3.msra.mxu1 %v608_v15 }
 0x3d0   :  { %904 = vmatprep.subr.mxu1 %v1078_v0 }
 0x3d1   :  { %905 = vmatpush3.msra.mxu1 %v607_v16 }
 0x3d2   :  { %906 = vmatprep.subr.mxu1 %v1078_v0 }
 0x3d3   :  { %907 = vmatpush3.msra.mxu1 %v606_v17 }
 0x3d4   :  { %908 = vmatprep.subr.mxu1 %v1078_v0 }
 0x3d5   :  { %909 = vmatpush3.msra.mxu1 %v605_v18 }
 0x3d6   :  { %910 = vmatprep.subr.mxu1 %v1078_v0 }
 0x3d7   :  { %911 = vmatpush3.msra.mxu1 %v604_v19 }
 0x3d8   :  { %912 = vmatprep.subr.mxu1 %v1078_v0 }
 0x3d9   :  { %913 = vmatpush3.msra.mxu1 %v603_v20 }
 0x3da   :  { %914 = vmatprep.subr.mxu1 %v1078_v0 }
 0x3db   :  { %915 = vmatpush3.msra.mxu1 %v602_v21 }
 0x3dc   :  { %916 = vmatprep.subr.mxu1 %v1078_v0 }
 0x3dd   :  { %917 = vmatpush3.msra.mxu1 %v601_v22 }
 0x476   :  { %v516_v23 = vpop.f32.mrf.mxu1 }
 0x477   :  { %520 = vst [vmem:[#allocation11] sm:$0xff] %v516_v23 }
 0x478   :  { %v874_v24 = vpop.f32.mrf.mxu1 }
 0x47e   :  { %v596_v26 = vpop.f32.mrf.mxu1 }
 0x47f   :  { %v597_v27 = vadd.f32 %v743_v25, %v596_v26 }
 0x480   :  { %v885_v28 = vpop.f32.mrf.mxu1 }
 0x481   :  { %v600_v29 = vmax.f32 %v597_v27, 0.0 }
 0x483   :  { %919 = vmatmul.mubr.f32.vlgmr.msra.gmra.mxu1 %v600_v29 }
 0x543   :  { %v688_v31 = vpop.f32.mrf.mxu1 }
 0x544   :  { %v689_v32 = vadd.f32 %v745_v30, %v688_v31 }
 0x545   :  { %v920_v33 = vpop.f32.mrf.mxu1 }
 0x546   :  { %692 = vmax.xlane.f32.xlu1 %v689_v32 }
 0x5cf   :  { %v693_v34 = vpop.xlane.xlu1 %692 }
 0x5d0   :  { %v694_v35 = vsub.f32 %v689_v32, %v693_v34 }
 0x5d2   :  { %v695_v36 = vmul.f32 1.442695, %v694_v35 }
 0x5d4   :  { %938 = vpow2.f32 %v695_v36 }
 0x5e1   :  { %v939_v0 = vpop.eup %938 }
 0x5e2   :  { %697 = vadd.xlane.f32.xlu0 %v939_v0 }
 0x5e3   :  { %1033 = shalt.err (!%p1030_p10)
}
 0x5e4   :  { %722 = dma.vmem_to_hbm [thread:$0]  %s720_s15, 128, %s1204_s5, [#allocation12]  }
 0x5e5   :  { %s1084_s19 = smov [#allocation10]  }
 0x5e6   :  { %s709_s20 = sshll.u32 %s1084_s19, 4  ;;  %s710_s20 = int_to_ptr.vmem [resolvable:$true] %s709_s20 }
 0x5e7   :  { %s1042_s21 = scalar_lea.vmem %s710_s20, 128  ;;  %p1047_p12 = scmp.lt.s32.totalorder %s710_s20, %s710_s20 }
 0x5e8   :  { %p1043_p11 = scmp.ne.s32.totalorder %s710_s20, %s1042_s21  ;;  %p1048_p13 = scmp.lt.s32.totalorder %s1042_s21, %s1042_s21 }
 0x5ea   :  { %p1049_p0 = por %p1048_p13, %p1047_p12 }
 0x5ec   :  { %p1050_p1 = pnand %p1049_p0, %p1043_p11 }
 0x66b   :  { %v698_v37 = vpop.xlane.xlu0 %697 }
 0x66c   :  { %940 = vlog2.f32 %v698_v37 }
 0x679   :  { %v941_v38 = vpop.eup %940 }
 0x67a   :  { %v700_v39 = vmul.f32 0.6931472, %v941_v38 }
 0x67c   :  { %v701_v40 = vsub.f32 %v694_v35, %v700_v39 }
 0x67e   :  { %702 = vst [vmem:[#allocation10] sm:$0xff] %v701_v40 }
 0x67f   :  { %1053 = shalt.err (!%p1050_p1)
}
 0x680   :  { %712 = dma.vmem_to_hbm [thread:$0]  %s710_s20, 128, %s1203_s4, [#allocation4]  }
 0x681   :  { %1068 = dma.done.wait [#allocation4], 128  }
 0x682   :  { %1069 = vsyncadd [#allocation4], 4294967168 }
 0x683   :  { %1070 = dma.done.wait [#allocation12], 128  }
 0x684   :  { %1071 = vsyncadd [#allocation12], 4294967168 }
 0x685   :  { %729 = vsyncpa [#allocation3], 1 }
 0x686   :  { %730 = vsyncpa [#allocation6], 1 }
 0x687   :  { %731 = vsyncpa [#allocation9], 1 }
 0x688   :  { %732 = vsyncpa [#allocation4], 1 }
 0x689   :  { %733 = vsyncpa [#allocation12], 1 }

</bundles_post_ra>
